<compile_context>
chip_gen: v7x
topology: tpu7x:2x2x1
jax: 0.10.0
libtpu: 0.0.40
codegen_flags: <defaults>
</compile_context>

<pallas_src>
import functools

import jax
import jax.numpy as jnp
from jax import lax
from jax.experimental import pallas as pl
from jax.experimental.pallas import tpu as pltpu

_EPS = 1e-8          # F.cosine_similarity default eps
_MIB = 1024 * 1024


def _rup(x, m):
    return ((x + m - 1) // m) * m


def _softmax_rows(x, valid=None):
    """Row-wise softmax over the last axis.  `valid` (static int) masks padded
    lane columns (index >= valid) so host-side zero padding of w stays exact.
    The approximate EUP reciprocal is safe here: the per-row scale error
    cancels exactly in the downstream L2 row-normalization."""
    masked = valid is not None and valid < x.shape[-1]
    if masked:
        col = lax.broadcasted_iota(jnp.int32, x.shape, dimension=x.ndim - 1)
        keep = col < valid
        x = jnp.where(keep, x, jnp.float32(-1e30))
    m = jnp.max(x, axis=-1, keepdims=True)
    e = jnp.exp(x - m)
    if masked:
        e = jnp.where(keep, e, jnp.float32(0.0))
    s = jnp.sum(e, axis=-1, keepdims=True)
    return e * pl.reciprocal(s, approx=True)


def _unit_rows(p):
    # Row-wise L2 normalization.  eps clamp mirrors F.cosine_similarity; it
    # never binds for softmax rows (||row||^2 >= 1/L >> eps^2).
    sq = jnp.sum(p * p, axis=-1, keepdims=True)
    return p * lax.rsqrt(jnp.maximum(sq, jnp.float32(_EPS * _EPS)))


def _cst_loss_kernel(out_ref, tgt_ref, loss_ref,
                     o_h_acc, t_h_acc, o_w_acc, t_w_acc,
                     *, n, c, h, w, w_p, tile_w, nb):
    wt = pl.program_id(1)
    n_wt = w_p // tile_w

    # Streaming accumulation of the raw marginal sums.  The folded batches
    # (nb is static, small) are handled with a trace-time loop so every op is
    # a plain 2-D/3-D sublane/lane reduce.
    for b in range(nb):
        ob = out_ref[b]                                   # (c, h, tile_w)
        tb = tgt_ref[b]
        # Fused upcast-accumulate: no full-tile f32 copy is materialized.
        o_h_sum = jnp.sum(ob, axis=-1, dtype=jnp.float32)   # (c, h)   lane reduce
        t_h_sum = jnp.sum(tb, axis=-1, dtype=jnp.float32)
        o_w_sum = jnp.sum(ob, axis=-2, dtype=jnp.float32)   # (c, tile_w) sublane
        t_w_sum = jnp.sum(tb, axis=-2, dtype=jnp.float32)

        if n_wt == 1:
            o_h_acc[b] = o_h_sum
            t_h_acc[b] = t_h_sum
            o_w_acc[b] = o_w_sum
            t_w_acc[b] = t_w_sum
        else:
            # First tile stores directly (no zero-init + add): saves one
            # store plus a load/add per accumulator (vst slots on v5e).
            @pl.when(wt == 0)
            def _first(b=b, o_h_sum=o_h_sum, t_h_sum=t_h_sum):
                o_h_acc[b] = o_h_sum
                t_h_acc[b] = t_h_sum

            @pl.when(wt != 0)
            def _accum(b=b, o_h_sum=o_h_sum, t_h_sum=t_h_sum):
                o_h_acc[b] += o_h_sum
                t_h_acc[b] += t_h_sum

            # Each w-tile hits a distinct, 128-aligned lane slice: plain store.
            col0 = pl.multiple_of(wt * tile_w, 128)
            o_w_acc[b, :, pl.ds(col0, tile_w)] = o_w_sum
            t_w_acc[b, :, pl.ds(col0, tile_w)] = t_w_sum

    @pl.when(wt == n_wt - 1)
    def _finalize():
        inv_w = jnp.float32(1.0 / w)        # true w (zero padding is exact)
        inv_h = jnp.float32(1.0 / h)
        valid_w = w if w_p > w else None
        scale = jnp.float32(1.0 / (c * n))

        # Per folded batch (trace-time loop): keeps the f32 temporaries small
        # so finalize never dominates the VMEM budget.
        for b in range(nb):
            nPo_h = _unit_rows(_softmax_rows(o_h_acc[b] * inv_w))
            nPt_h = _unit_rows(_softmax_rows(t_h_acc[b] * inv_w))
            nPo_w = _unit_rows(_softmax_rows(o_w_acc[b] * inv_h, valid_w))
            nPt_w = _unit_rows(_softmax_rows(t_w_acc[b] * inv_h, valid_w))

            # Positive-pair cosine per channel.
            pos_h = jnp.sum(nPo_h * nPt_h, axis=-1)           # (c,)
            pos_w = jnp.sum(nPo_w * nPt_w, axis=-1)
            sim_pos = 0.5 * (pos_h + pos_w)

            # Sum over all c x c pairwise cosines via the separable
            # denominator (no (c,c) einsum / MXU work).
            sa_h = jnp.sum(nPo_h, axis=0, keepdims=True)      # (1, h)
            sb_h = jnp.sum(nPt_h, axis=0, keepdims=True)
            sa_w = jnp.sum(nPo_w, axis=0, keepdims=True)      # (1, w_p)
            sb_w = jnp.sum(nPt_w, axis=0, keepdims=True)
            sim = 0.5 * (jnp.sum(sa_h * sb_h) + jnp.sum(sa_w * sb_w))

            loss_b = -jnp.log(sim_pos / sim) * scale          # (c,)
            loss_ref[b, 0, :] = loss_b.astype(loss_ref.dtype)


# ---------------------------------------------------------------------------
# Tiling plan: generation-aware VMEM budgeting.
# ---------------------------------------------------------------------------

def _vmem_capacity_bytes():
    try:
        cap = getattr(pltpu.get_tpu_info(), "vmem_capacity_bytes", None)
        if cap:
            return int(cap)
    except Exception:
        pass
    return 64 * _MIB            # conservative floor (v7x per-TC VMEM)


def _sublane_pack(itemsize):
    return 8 * max(1, 4 // max(itemsize, 1))   # 8 f32, 16 bf16, 32 int8


def _stream_bytes(nb, c, h, lanes, itemsize, sub):
    """VMEM for the streaming inputs at one grid step: 2 inputs x 2 pipeline
    buffers, plus (conservatively) one f32 reduce temporary per input for
    sub-32-bit dtypes in case Mosaic materializes the upcast."""
    per_buf = nb * c * _rup(h, sub) * lanes * itemsize
    f32_tmp = nb * c * _rup(h, 8) * lanes * 4 if itemsize < 4 else 0
    return 2 * (2 * per_buf + f32_tmp)


def _fixed_bytes(nb, c, h, w_eff):
    """Persistent VMEM residents: 4 f32 accumulators (padded layout), the
    double-buffered output block, plus slack for finalize-time f32 temps."""
    acc = (2 * nb * _rup(c, 8) * _rup(h, 128) +
           2 * nb * _rup(c, 8) * _rup(w_eff, 128)) * 4
    out = 2 * nb * 8 * _rup(c, 128) * 4
    return 2 * acc + out + 4 * _MIB


def _plan(n, c, h, w, itemsize):
    """Pick (nb, tile_w, w_p, vmem_limit): nb = batches folded per grid step
    (small maps); tile_w = lane tile along w (large maps); w_p = host-padded w
    (only when tiling a non-128-aligned w)."""
    cap = _vmem_capacity_bytes()
    vmem_limit = (cap * 3) // 4          # ~96 MiB on v5e/v6e, ~48 MiB on v7x
    sub = _sublane_pack(itemsize)
    full_cols = _rup(w, 128)             # lane padding of an untiled w

    def fold_fits(nb):
        return (_stream_bytes(nb, c, h, full_cols, itemsize, sub)
                <= vmem_limit - _fixed_bytes(nb, c, h, w))

    if fold_fits(1):
        # Whole per-batch map fits in a tile: fold several batches per step so
        # the per-step DMA is MB-scale (amortizes the ~0.35 us/step overhead).
        nb = 1
        for cand in range(2, min(n, 64) + 1):
            if n % cand:
                continue
            if n // cand < 2:            # keep >=2 grid steps (megacore/pipe)
                break
            if not fold_fits(cand):
                break
            if cand * c * _rup(h, sub) * full_cols * itemsize > 16 * _MIB:
                break
            nb = cand
        return nb, w, w, vmem_limit

    # Large per-batch map: stream w in 128-multiple lane tiles (nb = 1).
    if w <= 128:
        # Lane axis cannot be split further; best effort with the full w.
        # TODO(synk): maps this large would additionally need h tiling.
        need = _stream_bytes(1, c, h, full_cols, itemsize, sub) + _fixed_bytes(1, c, h, w)
        vmem_limit = max(vmem_limit, min(cap - 2 * _MIB, need))
        return 1, w, w, vmem_limit

    w_p = _rup(w, 128)
    budget = vmem_limit - _fixed_bytes(1, c, h, w_p)
    per_col = _stream_bytes(1, c, h, 1, itemsize, sub)
    tile_w = (max(budget, 0) // max(per_col, 1)) // 128 * 128
    tile_w = int(min(max(tile_w, 128), w_p))
    while w_p % tile_w:
        tile_w -= 128
    need = _stream_bytes(1, c, h, tile_w, itemsize, sub) + _fixed_bytes(1, c, h, w_p)
    if need > vmem_limit:
        # Even a 128-lane tile overflows the default budget: raise the scoped
        # limit as far as the chip allows.  TODO(synk): beyond this, h would
        # also need to be tiled.
        vmem_limit = min(cap - 2 * _MIB, need)
    return 1, tile_w, w_p, vmem_limit


# ---------------------------------------------------------------------------
# Wrapper.
# ---------------------------------------------------------------------------

def cst_loss(output, target, *, _plan_override=None):
    """Pallas CstLoss forward. output, target: (n, c, h, w). Returns (n, c)."""
    n, c, h, w = output.shape
    assert target.shape == output.shape
    itemsize = jnp.dtype(output.dtype).itemsize

    if _plan_override is None:
        nb, tile_w, w_p, vmem_limit = _plan(n, c, h, w, itemsize)
    else:
        nb, tile_w, w_p, vmem_limit = _plan_override
    n_wt = w_p // tile_w

    if w_p != w:
        # Zero-pad w to a 128 multiple so lane tiles are aligned; zeros are
        # exact for the raw sums and the pad columns are masked at finalize.
        # TODO(synk): this costs one extra HBM pass; a fused pad (or h tiling)
        # would avoid it for very large non-aligned-w maps.
        pad = ((0, 0), (0, 0), (0, 0), (0, w_p - w))
        output = jnp.pad(output, pad)
        target = jnp.pad(target, pad)

    kernel = functools.partial(_cst_loss_kernel, n=n, c=c, h=h, w=w,
                               w_p=w_p, tile_w=tile_w, nb=nb)

    loss3 = pl.pallas_call(
        kernel,
        out_shape=jax.ShapeDtypeStruct((n, 1, c), jnp.float32),
        grid_spec=pltpu.PrefetchScalarGridSpec(
            num_scalar_prefetch=0,
            grid=(n // nb, n_wt),
            in_specs=[
                pl.BlockSpec((nb, c, h, tile_w), lambda i, j: (i, 0, 0, j)),
                pl.BlockSpec((nb, c, h, tile_w), lambda i, j: (i, 0, 0, j)),
            ],
            out_specs=pl.BlockSpec((nb, 1, c), lambda i, j: (i, 0, 0)),
            scratch_shapes=[
                pltpu.VMEM((nb, c, h), jnp.float32),    # o_h accumulator
                pltpu.VMEM((nb, c, h), jnp.float32),    # t_h accumulator
                pltpu.VMEM((nb, c, w_p), jnp.float32),  # o_w accumulator
                pltpu.VMEM((nb, c, w_p), jnp.float32),  # t_w accumulator
            ],
        ),
        compiler_params=pltpu.CompilerParams(
            dimension_semantics=("parallel", "arbitrary"),
            vmem_limit_bytes=int(vmem_limit),
        ),
    )(output, target)
    return loss3.reshape(n, c)


def cst_loss_ref(output, target):
    """Pure-JAX reference (same intended semantics) for validation."""
    o = output.astype(jnp.float32)
    t = target.astype(jnp.float32)
    n, c, h, w = o.shape
    Po_h = jax.nn.softmax(jnp.mean(o, axis=-1), axis=-1)
    Pt_h = jax.nn.softmax(jnp.mean(t, axis=-1), axis=-1)
    Po_w = jax.nn.softmax(jnp.mean(o, axis=-2), axis=-1)
    Pt_w = jax.nn.softmax(jnp.mean(t, axis=-2), axis=-1)

    def cos(a, b):
        w12 = jnp.sum(a * b, axis=-1)
        w1 = jnp.sum(a * a, axis=-1)
        w2 = jnp.sum(b * b, axis=-1)
        return w12 / jnp.sqrt(jnp.maximum(w1 * w2, _EPS * _EPS))

    sim_pos = 0.5 * (cos(Po_h, Pt_h) + cos(Po_w, Pt_w))
    sim = jnp.zeros((n,), jnp.float32)
    for i in range(c):
        for j in range(c):
            vh = cos(Po_h[:, i, :], Pt_h[:, j, :])
            vw = cos(Po_w[:, i, :], Pt_w[:, j, :])
            sim = sim + 0.5 * (vh + vw)
    loss = -jnp.log(sim_pos / sim[:, None])
    return loss / c / n


if __name__ == "__main__":
    root = jax.random.PRNGKey(0)

    def _run_case(idx, shape, plan=None):
        k1, k2 = jax.random.split(jax.random.fold_in(root, idx))
        output = jax.random.normal(k1, shape, dtype=jnp.float32)
        target = jax.random.normal(k2, shape, dtype=jnp.float32)
        got = jax.block_until_ready(cst_loss(output, target, _plan_override=plan))
        ref = jax.block_until_ready(cst_loss_ref(output, target))
        assert got.shape == (shape[0], shape[1])
        assert jnp.allclose(got, ref, rtol=1e-4, atol=1e-6), (idx, got, ref)

    # 1) tiny map, auto plan (nb=1, single w tile) -- the nominal test shape.
    _run_case(0, (2, 4, 16, 16))
    # 2) batch-folding path: several batches per grid step (auto plan -> nb=4).
    _run_case(1, (8, 4, 16, 16))
    # 3) streamed w tiles (forced small tile): nb=1, tile_w=128, two w steps.
    _run_case(2, (2, 4, 16, 256), plan=(1, 128, 256, 48 * _MIB))
    # 4) non-128-aligned w -> host zero-pad (200 -> 256) + lane masking.
    _run_case(3, (2, 4, 16, 200), plan=(1, 128, 256, 48 * _MIB))

    print("KERNEL_OK")
</pallas_src>

<mosaic_0001>
module attributes {stable_mosaic.version = 11 : i64} {
  func.func @_cst_loss_kernel(%arg0: i32, %arg1: i32, %arg2: memref<1x4x16x16xf32, #tpu.memory_space<vmem>>, %arg3: memref<1x4x16x16xf32, #tpu.memory_space<vmem>>, %arg4: memref<1x1x4xf32, #tpu.memory_space<vmem>>, %arg5: memref<1x4x16xf32, #tpu.memory_space<vmem>>, %arg6: memref<1x4x16xf32, #tpu.memory_space<vmem>>, %arg7: memref<1x4x16xf32, #tpu.memory_space<vmem>>, %arg8: memref<1x4x16xf32, #tpu.memory_space<vmem>>) attributes {dimension_semantics = [#tpu.dimension_semantics<parallel>, #tpu.dimension_semantics<arbitrary>], iteration_bounds = array<i64: 2, 1>, scalar_prefetch = 0 : i64, scratch_operands = 4 : i64, tpu.core_type = #tpu.core_type<tc>, window_params = [{transform_indices = @transform_0, window_bounds = array<i64: 1, 4, 16, 16>}, {transform_indices = @transform_1, window_bounds = array<i64: 1, 4, 16, 16>}, {transform_indices = @transform_2, window_bounds = array<i64: 1, 1, 4>}]} {
    %c0 = arith.constant 0 : index
    %c0_0 = arith.constant 0 : index
    %c0_1 = arith.constant 0 : index
    %c0_2 = arith.constant 0 : index
    %0 = vector.load %arg2[%c0, %c0_0, %c0_1, %c0_2] : memref<1x4x16x16xf32, #tpu.memory_space<vmem>>, vector<1x4x16x16xf32>
    %1 = vector.shape_cast %0 : vector<1x4x16x16xf32> to vector<4x16x16xf32>
    %c0_3 = arith.constant 0 : index
    %c0_4 = arith.constant 0 : index
    %c0_5 = arith.constant 0 : index
    %c0_6 = arith.constant 0 : index
    %2 = vector.load %arg3[%c0_3, %c0_4, %c0_5, %c0_6] : memref<1x4x16x16xf32, #tpu.memory_space<vmem>>, vector<1x4x16x16xf32>
    %3 = vector.shape_cast %2 : vector<1x4x16x16xf32> to vector<4x16x16xf32>
    %cst = arith.constant dense<0.000000e+00> : vector<4x16xf32>
    %4 = vector.multi_reduction <add>, %1, %cst [2] : vector<4x16x16xf32> to vector<4x16xf32>
    %cst_7 = arith.constant dense<0.000000e+00> : vector<4x16xf32>
    %5 = vector.multi_reduction <add>, %3, %cst_7 [2] : vector<4x16x16xf32> to vector<4x16xf32>
    %cst_8 = arith.constant dense<0.000000e+00> : vector<4x16xf32>
    %6 = vector.multi_reduction <add>, %1, %cst_8 [1] : vector<4x16x16xf32> to vector<4x16xf32>
    %cst_9 = arith.constant dense<0.000000e+00> : vector<4x16xf32>
    %7 = vector.multi_reduction <add>, %3, %cst_9 [1] : vector<4x16x16xf32> to vector<4x16xf32>
    %c0_10 = arith.constant 0 : index
    %c0_11 = arith.constant 0 : index
    %c0_12 = arith.constant 0 : index
    %8 = vector.load %arg5[%c0_10, %c0_11, %c0_12] : memref<1x4x16xf32, #tpu.memory_space<vmem>>, vector<1x4x16xf32>
    %9 = vector.shape_cast %8 : vector<1x4x16xf32> to vector<4x16xf32>
    %10 = vector.shape_cast %4 : vector<4x16xf32> to vector<1x4x16xf32>
    tpu.vector_store %arg5[%c0_10, %c0_11, %c0_12], %10 {strides = array<i32>} : memref<1x4x16xf32, #tpu.memory_space<vmem>>, vector<1x4x16xf32>,
    %c0_13 = arith.constant 0 : index
    %c0_14 = arith.constant 0 : index
    %c0_15 = arith.constant 0 : index
    %11 = vector.load %arg6[%c0_13, %c0_14, %c0_15] : memref<1x4x16xf32, #tpu.memory_space<vmem>>, vector<1x4x16xf32>
    %12 = vector.shape_cast %11 : vector<1x4x16xf32> to vector<4x16xf32>
    %13 = vector.shape_cast %5 : vector<4x16xf32> to vector<1x4x16xf32>
    tpu.vector_store %arg6[%c0_13, %c0_14, %c0_15], %13 {strides = array<i32>} : memref<1x4x16xf32, #tpu.memory_space<vmem>>, vector<1x4x16xf32>,
    %c0_16 = arith.constant 0 : index
    %c0_17 = arith.constant 0 : index
    %c0_18 = arith.constant 0 : index
    %14 = vector.load %arg7[%c0_16, %c0_17, %c0_18] : memref<1x4x16xf32, #tpu.memory_space<vmem>>, vector<1x4x16xf32>
    %15 = vector.shape_cast %14 : vector<1x4x16xf32> to vector<4x16xf32>
    %16 = vector.shape_cast %6 : vector<4x16xf32> to vector<1x4x16xf32>
    tpu.vector_store %arg7[%c0_16, %c0_17, %c0_18], %16 {strides = array<i32>} : memref<1x4x16xf32, #tpu.memory_space<vmem>>, vector<1x4x16xf32>,
    %c0_19 = arith.constant 0 : index
    %c0_20 = arith.constant 0 : index
    %c0_21 = arith.constant 0 : index
    %17 = vector.load %arg8[%c0_19, %c0_20, %c0_21] : memref<1x4x16xf32, #tpu.memory_space<vmem>>, vector<1x4x16xf32>
    %18 = vector.shape_cast %17 : vector<1x4x16xf32> to vector<4x16xf32>
    %19 = vector.shape_cast %7 : vector<4x16xf32> to vector<1x4x16xf32>
    tpu.vector_store %arg8[%c0_19, %c0_20, %c0_21], %19 {strides = array<i32>} : memref<1x4x16xf32, #tpu.memory_space<vmem>>, vector<1x4x16xf32>,
    %c0_i32 = arith.constant 0 : i32
    %20 = arith.cmpi eq, %arg1, %c0_i32 : i32
    %21 = arith.extui %20 : i1 to i32
    %c0_i32_22 = arith.constant 0 : i32
    %22 = arith.cmpi ne, %21, %c0_i32_22 : i32
    scf.if %22 {
      %c0_23 = arith.constant 0 : index
      %c0_24 = arith.constant 0 : index
      %c0_25 = arith.constant 0 : index
      %23 = vector.load %arg5[%c0_23, %c0_24, %c0_25] : memref<1x4x16xf32, #tpu.memory_space<vmem>>, vector<1x4x16xf32>
      %24 = vector.shape_cast %23 : vector<1x4x16xf32> to vector<4x16xf32>
      %cst_26 = arith.constant 6.250000e-02 : f32
      %25 = vector.broadcast %cst_26 : f32 to vector<4x16xf32>
      %26 = arith.mulf %24, %25 : vector<4x16xf32>
      %cst_27 = arith.constant dense<0xFF800000> : vector<4xf32>
      %27 = vector.multi_reduction <maximumf>, %26, %cst_27 [1] : vector<4x16xf32> to vector<4xf32>
      %28 = vector.shape_cast %27 : vector<4xf32> to vector<4x1xf32>
      %29 = vector.broadcast %28 : vector<4x1xf32> to vector<4x16xf32>
      %30 = arith.subf %26, %29 : vector<4x16xf32>
      %31 = math.exp %30 : vector<4x16xf32>
      %cst_28 = arith.constant dense<0.000000e+00> : vector<4xf32>
      %32 = vector.multi_reduction <add>, %31, %cst_28 [1] : vector<4x16xf32> to vector<4xf32>
      %33 = vector.shape_cast %32 : vector<4xf32> to vector<4x1xf32>
      %34 = tpu.reciprocal %33 {approx = true} : vector<4x1xf32> -> vector<4x1xf32>
      %35 = vector.broadcast %34 : vector<4x1xf32> to vector<4x16xf32>
      %36 = arith.mulf %31, %35 : vector<4x16xf32>
      %37 = arith.mulf %36, %36 : vector<4x16xf32>
      %cst_29 = arith.constant dense<0.000000e+00> : vector<4xf32>
      %38 = vector.multi_reduction <add>, %37, %cst_29 [1] : vector<4x16xf32> to vector<4xf32>
      %39 = vector.shape_cast %38 : vector<4xf32> to vector<4x1xf32>
      %cst_30 = arith.constant 1.000000e-16 : f32
      %40 = vector.broadcast %cst_30 : f32 to vector<4x1xf32>
      %41 = arith.maximumf %39, %40 : vector<4x1xf32>
      %42 = math.rsqrt %41 : vector<4x1xf32>
      %43 = vector.broadcast %42 : vector<4x1xf32> to vector<4x16xf32>
      %44 = arith.mulf %36, %43 : vector<4x16xf32>
      %c0_31 = arith.constant 0 : index
      %c0_32 = arith.constant 0 : index
      %c0_33 = arith.constant 0 : index
      %45 = vector.load %arg6[%c0_31, %c0_32, %c0_33] : memref<1x4x16xf32, #tpu.memory_space<vmem>>, vector<1x4x16xf32>
      %46 = vector.shape_cast %45 : vector<1x4x16xf32> to vector<4x16xf32>
      %cst_34 = arith.constant 6.250000e-02 : f32
      %47 = vector.broadcast %cst_34 : f32 to vector<4x16xf32>
      %48 = arith.mulf %46, %47 : vector<4x16xf32>
      %cst_35 = arith.constant dense<0xFF800000> : vector<4xf32>
      %49 = vector.multi_reduction <maximumf>, %48, %cst_35 [1] : vector<4x16xf32> to vector<4xf32>
      %50 = vector.shape_cast %49 : vector<4xf32> to vector<4x1xf32>
      %51 = vector.broadcast %50 : vector<4x1xf32> to vector<4x16xf32>
      %52 = arith.subf %48, %51 : vector<4x16xf32>
      %53 = math.exp %52 : vector<4x16xf32>
      %cst_36 = arith.constant dense<0.000000e+00> : vector<4xf32>
      %54 = vector.multi_reduction <add>, %53, %cst_36 [1] : vector<4x16xf32> to vector<4xf32>
      %55 = vector.shape_cast %54 : vector<4xf32> to vector<4x1xf32>
      %56 = tpu.reciprocal %55 {approx = true} : vector<4x1xf32> -> vector<4x1xf32>
      %57 = vector.broadcast %56 : vector<4x1xf32> to vector<4x16xf32>
      %58 = arith.mulf %53, %57 : vector<4x16xf32>
      %59 = arith.mulf %58, %58 : vector<4x16xf32>
      %cst_37 = arith.constant dense<0.000000e+00> : vector<4xf32>
      %60 = vector.multi_reduction <add>, %59, %cst_37 [1] : vector<4x16xf32> to vector<4xf32>
      %61 = vector.shape_cast %60 : vector<4xf32> to vector<4x1xf32>
      %cst_38 = arith.constant 1.000000e-16 : f32
      %62 = vector.broadcast %cst_38 : f32 to vector<4x1xf32>
      %63 = arith.maximumf %61, %62 : vector<4x1xf32>
      %64 = math.rsqrt %63 : vector<4x1xf32>
      %65 = vector.broadcast %64 : vector<4x1xf32> to vector<4x16xf32>
      %66 = arith.mulf %58, %65 : vector<4x16xf32>
      %c0_39 = arith.constant 0 : index
      %c0_40 = arith.constant 0 : index
      %c0_41 = arith.constant 0 : index
      %67 = vector.load %arg7[%c0_39, %c0_40, %c0_41] : memref<1x4x16xf32, #tpu.memory_space<vmem>>, vector<1x4x16xf32>
      %68 = vector.shape_cast %67 : vector<1x4x16xf32> to vector<4x16xf32>
      %cst_42 = arith.constant 6.250000e-02 : f32
      %69 = vector.broadcast %cst_42 : f32 to vector<4x16xf32>
      %70 = arith.mulf %68, %69 : vector<4x16xf32>
      %cst_43 = arith.constant dense<0xFF800000> : vector<4xf32>
      %71 = vector.multi_reduction <maximumf>, %70, %cst_43 [1] : vector<4x16xf32> to vector<4xf32>
      %72 = vector.shape_cast %71 : vector<4xf32> to vector<4x1xf32>
      %73 = vector.broadcast %72 : vector<4x1xf32> to vector<4x16xf32>
      %74 = arith.subf %70, %73 : vector<4x16xf32>
      %75 = math.exp %74 : vector<4x16xf32>
      %cst_44 = arith.constant dense<0.000000e+00> : vector<4xf32>
      %76 = vector.multi_reduction <add>, %75, %cst_44 [1] : vector<4x16xf32> to vector<4xf32>
      %77 = vector.shape_cast %76 : vector<4xf32> to vector<4x1xf32>
      %78 = tpu.reciprocal %77 {approx = true} : vector<4x1xf32> -> vector<4x1xf32>
      %79 = vector.broadcast %78 : vector<4x1xf32> to vector<4x16xf32>
      %80 = arith.mulf %75, %79 : vector<4x16xf32>
      %81 = arith.mulf %80, %80 : vector<4x16xf32>
      %cst_45 = arith.constant dense<0.000000e+00> : vector<4xf32>
      %82 = vector.multi_reduction <add>, %81, %cst_45 [1] : vector<4x16xf32> to vector<4xf32>
      %83 = vector.shape_cast %82 : vector<4xf32> to vector<4x1xf32>
      %cst_46 = arith.constant 1.000000e-16 : f32
      %84 = vector.broadcast %cst_46 : f32 to vector<4x1xf32>
      %85 = arith.maximumf %83, %84 : vector<4x1xf32>
      %86 = math.rsqrt %85 : vector<4x1xf32>
      %87 = vector.broadcast %86 : vector<4x1xf32> to vector<4x16xf32>
      %88 = arith.mulf %80, %87 : vector<4x16xf32>
      %c0_47 = arith.constant 0 : index
      %c0_48 = arith.constant 0 : index
      %c0_49 = arith.constant 0 : index
      %89 = vector.load %arg8[%c0_47, %c0_48, %c0_49] : memref<1x4x16xf32, #tpu.memory_space<vmem>>, vector<1x4x16xf32>
      %90 = vector.shape_cast %89 : vector<1x4x16xf32> to vector<4x16xf32>
      %cst_50 = arith.constant 6.250000e-02 : f32
      %91 = vector.broadcast %cst_50 : f32 to vector<4x16xf32>
      %92 = arith.mulf %90, %91 : vector<4x16xf32>
      %cst_51 = arith.constant dense<0xFF800000> : vector<4xf32>
      %93 = vector.multi_reduction <maximumf>, %92, %cst_51 [1] : vector<4x16xf32> to vector<4xf32>
      %94 = vector.shape_cast %93 : vector<4xf32> to vector<4x1xf32>
      %95 = vector.broadcast %94 : vector<4x1xf32> to vector<4x16xf32>
      %96 = arith.subf %92, %95 : vector<4x16xf32>
      %97 = math.exp %96 : vector<4x16xf32>
      %cst_52 = arith.constant dense<0.000000e+00> : vector<4xf32>
      %98 = vector.multi_reduction <add>, %97, %cst_52 [1] : vector<4x16xf32> to vector<4xf32>
      %99 = vector.shape_cast %98 : vector<4xf32> to vector<4x1xf32>
      %100 = tpu.reciprocal %99 {approx = true} : vector<4x1xf32> -> vector<4x1xf32>
      %101 = vector.broadcast %100 : vector<4x1xf32> to vector<4x16xf32>
      %102 = arith.mulf %97, %101 : vector<4x16xf32>
      %103 = arith.mulf %102, %102 : vector<4x16xf32>
      %cst_53 = arith.constant dense<0.000000e+00> : vector<4xf32>
      %104 = vector.multi_reduction <add>, %103, %cst_53 [1] : vector<4x16xf32> to vector<4xf32>
      %105 = vector.shape_cast %104 : vector<4xf32> to vector<4x1xf32>
      %cst_54 = arith.constant 1.000000e-16 : f32
      %106 = vector.broadcast %cst_54 : f32 to vector<4x1xf32>
      %107 = arith.maximumf %105, %106 : vector<4x1xf32>
      %108 = math.rsqrt %107 : vector<4x1xf32>
      %109 = vector.broadcast %108 : vector<4x1xf32> to vector<4x16xf32>
      %110 = arith.mulf %102, %109 : vector<4x16xf32>
      %111 = arith.mulf %44, %66 : vector<4x16xf32>
      %cst_55 = arith.constant dense<0.000000e+00> : vector<4xf32>
      %112 = vector.multi_reduction <add>, %111, %cst_55 [1] : vector<4x16xf32> to vector<4xf32>
      %113 = arith.mulf %88, %110 : vector<4x16xf32>
      %cst_56 = arith.constant dense<0.000000e+00> : vector<4xf32>
      %114 = vector.multi_reduction <add>, %113, %cst_56 [1] : vector<4x16xf32> to vector<4xf32>
      %115 = arith.addf %112, %114 : vector<4xf32>
      %cst_57 = arith.constant 5.000000e-01 : f32
      %116 = vector.broadcast %cst_57 : f32 to vector<4xf32>
      %117 = arith.mulf %116, %115 : vector<4xf32>
      %cst_58 = arith.constant dense<0.000000e+00> : vector<16xf32>
      %118 = vector.multi_reduction <add>, %44, %cst_58 [0] : vector<4x16xf32> to vector<16xf32>
      %119 = vector.shape_cast %118 : vector<16xf32> to vector<1x16xf32>
      %cst_59 = arith.constant dense<0.000000e+00> : vector<16xf32>
      %120 = vector.multi_reduction <add>, %66, %cst_59 [0] : vector<4x16xf32> to vector<16xf32>
      %121 = vector.shape_cast %120 : vector<16xf32> to vector<1x16xf32>
      %cst_60 = arith.constant dense<0.000000e+00> : vector<16xf32>
      %122 = vector.multi_reduction <add>, %88, %cst_60 [0] : vector<4x16xf32> to vector<16xf32>
      %123 = vector.shape_cast %122 : vector<16xf32> to vector<1x16xf32>
      %cst_61 = arith.constant dense<0.000000e+00> : vector<16xf32>
      %124 = vector.multi_reduction <add>, %110, %cst_61 [0] : vector<4x16xf32> to vector<16xf32>
      %125 = vector.shape_cast %124 : vector<16xf32> to vector<1x16xf32>
      %126 = arith.mulf %119, %121 : vector<1x16xf32>
      %127 = vector.shape_cast %126 : vector<1x16xf32> to vector<1x1x16xf32>
      %cst_62 = arith.constant dense<0.000000e+00> : vector<1xf32>
      %128 = vector.multi_reduction <add>, %127, %cst_62 [1, 2] : vector<1x1x16xf32> to vector<1xf32>
      %129 = vector.shape_cast %128 : vector<1xf32> to vector<1x1x1xf32>
      %130 = vector.extract %129[0, 0, 0] : f32 from vector<1x1x1xf32>
      %131 = arith.mulf %123, %125 : vector<1x16xf32>
      %132 = vector.shape_cast %131 : vector<1x16xf32> to vector<1x1x16xf32>
      %cst_63 = arith.constant dense<0.000000e+00> : vector<1xf32>
      %133 = vector.multi_reduction <add>, %132, %cst_63 [1, 2] : vector<1x1x16xf32> to vector<1xf32>
      %134 = vector.shape_cast %133 : vector<1xf32> to vector<1x1x1xf32>
      %135 = vector.extract %134[0, 0, 0] : f32 from vector<1x1x1xf32>
      %136 = arith.addf %130, %135 : f32
      %cst_64 = arith.constant 5.000000e-01 : f32
      %137 = arith.mulf %cst_64, %136 : f32
      %138 = vector.broadcast %137 : f32 to vector<4xf32>
      %139 = arith.divf %117, %138 : vector<4xf32>
      %140 = math.log %139 : vector<4xf32>
      %cst_65 = arith.constant 0.000000e+00 : f32
      %141 = vector.broadcast %cst_65 : f32 to vector<4xf32>
      %142 = arith.subf %141, %140 : vector<4xf32>
      %cst_66 = arith.constant 1.250000e-01 : f32
      %143 = vector.broadcast %cst_66 : f32 to vector<4xf32>
      %144 = arith.mulf %142, %143 : vector<4xf32>
      %c0_67 = arith.constant 0 : index
      %c0_68 = arith.constant 0 : index
      %c0_69 = arith.constant 0 : index
      %145 = vector.load %arg4[%c0_67, %c0_68, %c0_69] : memref<1x1x4xf32, #tpu.memory_space<vmem>>, vector<1x1x4xf32>
      %146 = vector.shape_cast %145 : vector<1x1x4xf32> to vector<4xf32>
      %147 = vector.shape_cast %144 : vector<4xf32> to vector<1x1x4xf32>
      tpu.vector_store %arg4[%c0_67, %c0_68, %c0_69], %147 {strides = array<i32>} : memref<1x1x4xf32, #tpu.memory_space<vmem>>, vector<1x1x4xf32>,
    } else {
    }
    return
  }
  func.func @transform_0(%arg0: i32, %arg1: i32) -> (i32, i32, i32, i32) {
    %c0_i32 = arith.constant 0 : i32
    %c0_i32_0 = arith.constant 0 : i32
    %c0_i32_1 = arith.constant 0 : i32
    return %arg0, %c0_i32, %c0_i32_0, %arg1 : i32, i32, i32, i32
  }
  func.func @transform_1(%arg0: i32, %arg1: i32) -> (i32, i32, i32, i32) {
    %c0_i32 = arith.constant 0 : i32
    %c0_i32_0 = arith.constant 0 : i32
    %c0_i32_1 = arith.constant 0 : i32
    return %arg0, %c0_i32, %c0_i32_0, %arg1 : i32, i32, i32, i32
  }
  func.func @transform_2(%arg0: i32, %arg1: i32) -> (i32, i32, i32) {
    %c0_i32 = arith.constant 0 : i32
    %c0_i32_0 = arith.constant 0 : i32
    %c0_i32_1 = arith.constant 0 : i32
    return %arg0, %c0_i32, %c0_i32_0 : i32, i32, i32
  }
}

</mosaic_0001>

<bundles_post_ra>
// kernel: tpu_custom_call.1
= control target key start
LH: loop header
LB: loop body
LE: loop exit
PB: predicated region body
PF: predicated region fallthrough
CT: control target
= control target key end

     0   :  { %7 = vsyncpa [#allocation7], 0  ;;  %s1351_s0 = inlined_call_operand.hbm [shape: f32[2,4,16,16], index: 0, kind: input, shape index: {}]   ;;  %s1352_s1 = inlined_call_operand.hbm [shape: f32[2,4,16,16], index: 1, kind: input, shape index: {}]   ;;  %s1353_s2 = inlined_call_operand.hbm [shape: f32[2,1,4], index: 2, kind: output, shape index: {}]  }
   0x1   :  { %9 = vsyncpa [#allocation7 + $0x1], 0 }
   0x2   :  { %10 = vsyncpa [#allocation10], 0 }
   0x3   :  { %12 = vsyncpa [#allocation10 + $0x1], 0 }
   0x4   :  { %13 = vsyncpa [#allocation8], 0 }
   0x5   :  { %15 = vsyncpa [#allocation8 + $0x1], 0  ;;  %s1027_s9 = smov 0   ;;  %s1029_s10 = smov 0  }
   0x6   :  { %s1031_s11 = smov 0   ;;  %s1033_s12 = smov 0  }
   0x7   :  { %s1035_s13 = smov 0   ;;  %s1037_s14 = smov 0  }
   0x8 LB: > { %s740_s15 = sadd.s32 4294967295, %s1005_s14   ;;  %s741_s16 = sadd.s32 4294967294, %s1005_s14   ;;  %s1005_s14 = sphi %s1037_s14, %s21_s14   ;;  %s1001_s13 = sphi %s1035_s13, %s1371_s13   ;;  %s997_s12 = sphi %s1033_s12, %s1370_s12   ;;  %s993_s11 = sphi %s1031_s11, %s1369_s11   ;;  %s989_s10 = sphi %s1029_s10, %s1368_s10   ;;  %s985_s9 = sphi %s1027_s9, %s1367_s9  }
   0x9   : > { %s33_s17 = sadd.s32 1, %s1001_s13  ;;  %s42_s18 = sadd.s32 1, %s993_s11 }
   0xa   : > { %p35_p0 = scmp.ge.s32.totalorder %s33_s17, 2  ;;  %p49_p1 = scmp.ne.s32.totalorder %s993_s11, %s989_s10 }
   0xb   : > { %p50_p2 = scmp.eq.s32.totalorder %s1005_s14, 0  ;;  %p55_p3 = scmp.ne.s32.totalorder %s989_s10, %s985_s9 }
   0xc   : > { %s1373_s17 = smov (%p35_p0, %s33_s17), 0  ;;  %p56_p5 = scmp.eq.s32.totalorder %s740_s15, 0 }
   0xd   : > { %p1068_p4 = por %p50_p2, %p49_p1  ;;  %s37_s20 = ssub.s32 %s1001_s13, %s1373_s17 }
   0xe   : > { %p107_p6 = scmp.eq.s32.totalorder %s740_s15, 1  ;;  %p40_p7 = scmp.eq.s32.totalorder %s37_s20, 0 }
   0xf   : > { %p1074_p8 = por %p56_p5, %p55_p3  ;;  %p113_p10 = scmp.eq.s32.totalorder %s741_s16, 1 }
  0x10   : > { %p1078_p9 = por %p107_p6, %p49_p1  ;;  %p779_p13 = scmp.lt.s32.totalorder %s1005_s14, 2 }
  0x11   : > { %s1357_s21 = scalar_select %p1074_p8, 1, 0 }
  0x12   : > { %s1358_s22 = scalar_select %p1078_p9, 1, 0 }
  0x13   : > { %s1083_s23 = scalar_select %p40_p7, %s993_s11, %s42_s18  }
  0x14   : > { %p1085_p11 = por %p113_p10, %p55_p3  ;;  %s1092_s25 = sand.u32 1, %s993_s11  }
  0x15   : > { %s744_s26 = sshll.u32 %s1092_s25, 6  ;;  %s756_s27 = sshll.u32 %s1001_s13, 10 }
  0x16   : > { %s1359_s24 = scalar_select %p1085_p11, 1, 0 }
  0x17   : > { %s1101_s30 = scalar_lea.hbm %s1351_s0, %s756_s27  ;;  %s137_s3 = scalar_lea.vmem [#allocation6], %s744_s26 }
  0x18   : > { %s145_s4 = sshll.u32 %s137_s3, 4  ;;  %p1109_p0 = pnand %p779_p13, %p1068_p4  ;;  %s1105_s4 = int_to_ptr.vmem [resolvable:$true] %s145_s4 }
  0x19   : > { %s134_s6 = scalar_lea.sflag [#allocation7], %s1092_s25  ;;  %s859_s7 = scalar_lea.hbm %s1101_s30, 1024 }
  0x1a   : > { %p860_p2 = scmp.ne.s32.totalorder %s1101_s30, %s859_s7  ;;  %p861_p3 = pneg %p1109_p0 }
  0x1b   : > { %s864_s16 = scalar_lea.hbm %s1351_s0, 2048  ;;  %p865_p4 = scmp.lt.u32.totalorder %s1101_s30, %s1351_s0 }
  0x1c   : > { %p862_p5 = pnand %p861_p3, %p860_p2  ;;  %p866_p7 = scmp.lt.u32.totalorder %s864_s16, %s859_s7 }
  0x1d   : > { %p868_p13 = scmp.lt.u32.totalorder %s859_s7, %s1101_s30 }
  0x1e   : > { %p863_p6 = pneg %p862_p5  ;;  %p867_p10 = por %p866_p7, %p865_p4 }
  0x20   : > { %p869_p12 = por %p868_p13, %p867_p10 }
  0x22   : > { %p870_p1 = pnand %p869_p12, %p863_p6 }
  0x24   : > { %873 = shalt.err (!%p870_p1)
}
  0x25   : > { %s874_s20 = scalar_lea.vmem %s1105_s4, 1024  ;;  %s1007_s28 = smov [#allocation6]  }
  0x26   : > { %p875_p2 = scmp.ne.s32.totalorder %s1105_s4, %s874_s20  ;;  %s879_s29 = sshll.u32 %s1007_s28, 4  ;;  %s880_s29 = int_to_ptr.vmem [resolvable:$false] %s879_s29 }
  0x27   : > { %s881_s3 = scalar_lea.vmem %s880_s29, 2048  ;;  %p882_p9 = scmp.lt.s32.totalorder %s1105_s4, %s880_s29 }
  0x28   : > { %p877_p5 = pnand %p875_p2, %p861_p3  ;;  %p883_p4 = scmp.lt.s32.totalorder %s881_s3, %s874_s20 }
  0x2a   : > { %p878_p11 = pneg %p877_p5  ;;  %p884_p7 = por %p883_p4, %p882_p9 }
  0x2c   : > { %p885_p10 = pnand %p884_p7, %p878_p11 }
  0x2e   : > { %888 = shalt.err (!%p885_p10)
}
  0x2f   : > { %s1008_s7 = smov 128   ;;  %s1009_s8 = smov 8  }
  0x30   : > { %771 = dma.hbm_to_vmem [thread:$0]  (!%p1109_p0), %s1101_s30, 1024, %s1105_s4, %s134_s6, %s1008_s7, %s1008_s7, %s1009_s8  }
  0x31   : > { %p175_p9 = scmp.lt.s32.totalorder %s1005_s14, 3  ;;  %s1151_s18 = scalar_lea.hbm %s1352_s1, %s756_s27 }
  0x32   : > { %p1361_p11 = scmp.ge.s32.totalorder %s1005_s14, 1  ;;  %s159_s20 = scalar_lea.vmem [#allocation9], %s744_s26 }
  0x33   : > { %s167_s28 = sshll.u32 %s159_s20, 4  ;;  %s156_s30 = scalar_lea.sflag [#allocation10], %s1092_s25  ;;  %s1161_s28 = int_to_ptr.vmem [resolvable:$true] %s167_s28 }
  0x34   : > { %p1155_p12 = pnand %p1361_p11, %p175_p9  ;;  %s889_s4 = scalar_lea.hbm %s1151_s18, 1024 }
  0x35   : > { %p890_p1 = scmp.ne.s32.totalorder %s1151_s18, %s889_s4  ;;  %s894_s29 = scalar_lea.hbm %s1352_s1, 2048 }
  0x36   : > { %p895_p2 = scmp.lt.u32.totalorder %s1151_s18, %s1352_s1  ;;  %p896_p5 = scmp.lt.u32.totalorder %s894_s29, %s889_s4 }
  0x37   : > { %p892_p6 = pnand %p890_p1, %p861_p3  ;;  %p898_p7 = scmp.lt.u32.totalorder %s889_s4, %s1151_s18 }
  0x38   : > { %p897_p4 = por %p896_p5, %p895_p2 }
  0x39   : > { %p893_p13 = pneg %p892_p6 }
  0x3a   : > { %p899_p10 = por %p898_p7, %p897_p4 }
  0x3c   : > { %p900_p9 = pnand %p899_p10, %p893_p13 }
  0x3e   : > { %903 = shalt.err (!%p900_p9)
}
  0x3f   : > { %s904_s26 = scalar_lea.vmem %s1161_s28, 1024  ;;  %s1010_s16 = smov [#allocation9]  }
  0x40   : > { %p905_p11 = scmp.ne.s32.totalorder %s1161_s28, %s904_s26  ;;  %s909_s20 = sshll.u32 %s1010_s16, 4  ;;  %s910_s20 = int_to_ptr.vmem [resolvable:$false] %s909_s20 }
  0x41   : > { %s911_s27 = scalar_lea.vmem %s910_s20, 2048  ;;  %p912_p8 = scmp.lt.s32.totalorder %s1161_s28, %s910_s20 }
  0x42   : > { %p907_p1 = pnand %p905_p11, %p861_p3  ;;  %p913_p2 = scmp.lt.s32.totalorder %s911_s27, %s904_s26 }
  0x44   : > { %p908_p6 = pneg %p907_p1  ;;  %p914_p5 = por %p913_p2, %p912_p8 }
  0x46   : > { %p915_p4 = pnand %p914_p5, %p908_p6 }
  0x48   : > { %918 = shalt.err (!%p915_p4)
}
  0x49   : > { %774 = dma.hbm_to_vmem [thread:$0]  (!%p1109_p0), %s1151_s18, 1024, %s1161_s28, %s156_s30, %s1008_s7, %s1008_s7, %s1009_s8  }
  0x4a   : > { %179 = sbr.rel (%p1155_p12) target bundleno = 1019 (0x3fb), region = 28  ;;  %s1195_s4 = sand.u32 (!%p1155_p12), 1, %s989_s10  }
  0x4b   : > { %s751_s6 = sshll.u32 (!%p1155_p12), %s1195_s4, 6  ;;  %s182_s29 = scalar_lea.sflag (!%p1155_p12), [#allocation7], %s1195_s4 }
  0x4c   : > { %s1199_s5 = scalar_lea.vmem (!%p1155_p12), [#allocation6], %s751_s6  ;;  %p1363_p8 = scmp.ne.s32.totalorder (!%p1155_p12), %s1357_s21, 0 }
  0x51   : > { %972 = dma.done.wait (%p1363_p8), %s182_s29, 1024  }
  0x52   : > { %974 = vsyncadd (%p1363_p8), %s182_s29, 4294966272  ;;  %s191_s25 = scalar_lea.sflag [#allocation10], %s1195_s4  ;;  %s1206_s7 = scalar_lea.vmem [#allocation9], %s751_s6 }
  0x53   : > { %976 = dma.done.wait (%p1363_p8), %s191_s25, 1024  }
  0x54   : > { %978 = vsyncadd (%p1363_p8), %s191_s25, 4294966272  ;;  %vm235_vm0 = vcmask 130048   ;;  %v221_v0 = vld [vmem:[%s1199_s5 + $0x10] sm:$0xff]  ;;  %v219_v1 = vld [vmem:[%s1199_s5] sm:$0xff]  ;;  %vm388_vm1 = vcmask 1041409   ;;  %vm390_vm2 = vcmask 1042434  }
  0x55   : > { %v222_v2 = vld [vmem:[%s1199_s5 + $0x18] sm:$0xff]  ;;  %v242_v3 = vsel %vm235_vm0, %v221_v0, 0.0  ;;  %v236_v4 = vsel %vm235_vm0, %v219_v1, 0.0  ;;  %v220_v5 = vld [vmem:[%s1199_s5 + $0x8] sm:$0xff]  ;;  %v227_v9 = vld [vmem:[%s1206_s7] sm:$0xff]  ;;  %vm392_vm3 = vcmask 1043459  }
  0x56   : > { %243 = vadd.xlane.f32.xlu1 %v242_v3  ;;  %237 = vadd.xlane.f32.xlu0 %v236_v4  ;;  %v228_v6 = vld [vmem:[%s1206_s7 + $0x8] sm:$0xff]  ;;  %v245_v7 = vsel %vm235_vm0, %v222_v2, 0.0  ;;  %v239_v8 = vsel %vm235_vm0, %v220_v5, 0.0  ;;  %v230_v10 = vld [vmem:[%s1206_s7 + $0x18] sm:$0xff]  ;;  %v229_v11 = vld [vmem:[%s1206_s7 + $0x10] sm:$0xff]  ;;  %v260_v13 = vsel %vm235_vm0, %v227_v9, 0.0 }
  0x57   : > { %v263_v12 = vsel %vm235_vm0, %v228_v6, 0.0  ;;  %v269_v14 = vsel %vm235_vm0, %v230_v10, 0.0  ;;  %v266_v15 = vsel %vm235_vm0, %v229_v11, 0.0  ;;  %v232_v16 = vld [vmem:[%s1206_s7 + $0x28] sm:$0xff]  ;;  %v231_v17 = vld [vmem:[%s1206_s7 + $0x20] sm:$0xff]  ;;  %v234_v24 = vld [vmem:[%s1206_s7 + $0x38] sm:$0xff]  ;;  %v291_v26 = vadd.f32 %v245_v7, %v242_v3 }
  0x58   : > { %v312_v18 = vadd.f32 %v263_v12, %v260_v13  ;;  %v319_v19 = vadd.f32 %v269_v14, %v266_v15  ;;  %v224_v20 = vld [vmem:[%s1199_s5 + $0x28] sm:$0xff]  ;;  %v223_v21 = vld [vmem:[%s1199_s5 + $0x20] sm:$0xff]  ;;  %v275_v22 = vsel %vm235_vm0, %v232_v16, 0.0  ;;  %v272_v23 = vsel %vm235_vm0, %v231_v17, 0.0  ;;  %v233_v25 = vld [vmem:[%s1206_s7 + $0x30] sm:$0xff]  ;;  %s753_s28 = sshll.u32 %s997_s12, 4 }
  0x59   : > { %v284_v27 = vadd.f32 %v239_v8, %v236_v4  ;;  %v326_v28 = vadd.f32 %v275_v22, %v272_v23  ;;  %v251_v31 = vsel %vm235_vm0, %v224_v20, 0.0  ;;  %v248_v32 = vsel %vm235_vm0, %v223_v21, 0.0  ;;  %v226_v33 = vld [vmem:[%s1199_s5 + $0x38] sm:$0xff]  ;;  %v225_v34 = vld [vmem:[%s1199_s5 + $0x30] sm:$0xff]  ;;  %s218_s30 = scalar_lea.vmem [#allocation11], %s1195_s4  ;;  %s1302_s16 = scalar_lea.hbm %s1353_s2, %s753_s28 }
  0x5a   : > { %246 = vadd.xlane.f32.xlu1 %v245_v7  ;;  %240 = vadd.xlane.f32.xlu0 %v239_v8  ;;  %v313_v29 = vrot.slane %v312_v18, 4  ;;  %v320_v30 = vrot.slane %v319_v19, 4  ;;  %v281_v35 = vsel %vm235_vm0, %v234_v24, 0.0  ;;  %v278_v36 = vsel %vm235_vm0, %v233_v25, 0.0  ;;  %s639_s3 = sshll.u32 %s218_s30, 4  ;;  %s627_s20 = scalar_lea.sflag [#allocation8], %s1195_s4  ;;  %s1304_s3 = int_to_ptr.vmem [resolvable:$true] %s639_s3 }
  0x5b   : > { %v298_v37 = vadd.f32 %v251_v31, %v248_v32  ;;  %v333_v38 = vadd.f32 %v281_v35, %v278_v36  ;;  %v292_v39 = vrot.slane %v291_v26, 4  ;;  %v285_v40 = vrot.slane %v284_v27, 4  ;;  %s919_s27 = scalar_lea.vmem %s1304_s3, 16  ;;  %p1364_p3 = scmp.ne.s32.totalorder %s1358_s22, 0 }
  0x5c   : > { %v327_v41 = vrot.slane %v326_v28, 4  ;;  %v314_v42 = vadd.f32 %v313_v29, %v312_v18  ;;  %v321_v43 = vadd.f32 %v320_v30, %v319_v19  ;;  %v257_v44 = vsel %vm235_vm0, %v226_v33, 0.0  ;;  %p920_p0 = scmp.ne.s32.totalorder %s1304_s3, %s919_s27  ;;  %s1011_s12 = smov [#allocation11]  }
  0x5d   : > { %v254_v45 = vsel %vm235_vm0, %v225_v34, 0.0  ;;  %v299_v47 = vrot.slane %v298_v37, 4  ;;  %v334_v48 = vrot.slane %v333_v38, 4  ;;  %v293_v49 = vadd.f32 %v292_v39, %v291_v26  ;;  %s923_s6 = sshll.u32 %s1011_s12, 4  ;;  %s924_s6 = int_to_ptr.vmem [resolvable:$false] %s923_s6 }
  0x5e   : > { %264 = vadd.xlane.f32.xlu1 %v263_v12  ;;  %261 = vadd.xlane.f32.xlu0 %v260_v13  ;;  %v305_v46 = vadd.f32 %v257_v44, %v254_v45  ;;  %v286_v50 = vadd.f32 %v285_v40, %v284_v27  ;;  %v328_v51 = vadd.f32 %v327_v41, %v326_v28  ;;  %v315_v52 = vrot.slane %v314_v42, 2  ;;  %p921_p12 = pnand %p920_p0, %p1364_p3  ;;  %s925_s29 = scalar_lea.vmem %s924_s6, 32 }
  0x5f   : > { %v322_v53 = vrot.slane %v321_v43, 2  ;;  %v300_v55 = vadd.f32 %v299_v47, %v298_v37  ;;  %v335_v56 = vadd.f32 %v334_v48, %v333_v38  ;;  %v294_v57 = vrot.slane %v293_v49, 2  ;;  %p926_p7 = scmp.lt.s32.totalorder %s1304_s3, %s924_s6  ;;  %p927_p10 = scmp.lt.s32.totalorder %s925_s29, %s919_s27 }
  0x60   : > { %v306_v54 = vrot.slane %v305_v46, 4  ;;  %v287_v58 = vrot.slane %v286_v50, 2  ;;  %v329_v59 = vrot.slane %v328_v51, 2  ;;  %v316_v60 = vadd.f32 %v315_v52, %v314_v42  ;;  %p922_p13 = pneg %p921_p12 }
  0x61   : > { %v323_v61 = vadd.f32 %v322_v53, %v321_v43  ;;  %v301_v63 = vrot.slane %v300_v55, 2  ;;  %v336_v0 = vrot.slane %v335_v56, 2  ;;  %v295_v1 = vadd.f32 %v294_v57, %v293_v49  ;;  %p928_p9 = por %p927_p10, %p926_p7 }
  0x62   : > { %270 = vadd.xlane.f32.xlu1 %v269_v14  ;;  %267 = vadd.xlane.f32.xlu0 %v266_v15  ;;  %v307_v62 = vadd.f32 %v306_v54, %v305_v46  ;;  %v288_v2 = vadd.f32 %v287_v58, %v286_v50  ;;  %v330_v3 = vadd.f32 %v329_v59, %v328_v51  ;;  %v317_v4 = vrot.slane %v316_v60, 1 }
  0x63   : > { %v324_v5 = vrot.slane %v323_v61, 1  ;;  %v302_v7 = vadd.f32 %v301_v63, %v300_v55  ;;  %v337_v8 = vadd.f32 %v336_v0, %v335_v56  ;;  %v296_v9 = vrot.slane %v295_v1, 1  ;;  %p929_p11 = pnand %p928_p9, %p922_p13 }
  0x64   : > { %v308_v6 = vrot.slane %v307_v62, 2  ;;  %v289_v10 = vrot.slane %v288_v2, 1  ;;  %v331_v11 = vrot.slane %v330_v3, 1  ;;  %v318_v12 = vadd.f32 %v317_v4, %v316_v60 }
  0x65   : > { %v325_v13 = vadd.f32 %v324_v5, %v323_v61  ;;  %v303_v15 = vrot.slane %v302_v7, 1  ;;  %v338_v16 = vrot.slane %v337_v8, 1  ;;  %v297_v17 = vadd.f32 %v296_v9, %v295_v1 }
  0x66   : > { %252 = vadd.xlane.f32.xlu1 %v251_v31  ;;  %249 = vadd.xlane.f32.xlu0 %v248_v32  ;;  %v309_v14 = vadd.f32 %v308_v6, %v307_v62  ;;  %v290_v18 = vadd.f32 %v289_v10, %v288_v2  ;;  %v332_v19 = vadd.f32 %v331_v11, %v330_v3  ;;  %vm395_vm4 = vcmask 125952  }
  0x67   : > { %v459_v20 = vsel %vm388_vm1, %v325_v13, %v318_v12  ;;  %v348_v34 = vlaneseq  ;;  %vm359_vm5 = vcmask 130112   ;;  %vm587_vm6 = vcmask 122880  }
  0x68   : > { %v310_v21 = vrot.slane %v309_v14, 1  ;;  %v450_v24 = vsel %vm388_vm1, %v297_v17, %v290_v18  ;;  %v460_v25 = vsel %vm390_vm2, %v332_v19, %v459_v20  ;;  %vm624_vm7 = vcmask 24576  }
  0x69   : > { %v349_v37 = vand.u32 127, %v348_v34  ;;  %v351_v41 = vshrl.u32 %v348_v34, 7 }
  0x6a   : > { %276 = vadd.xlane.f32.xlu1 %v275_v22  ;;  %273 = vadd.xlane.f32.xlu0 %v272_v23  ;;  %v304_v22 = vadd.f32 %v303_v15, %v302_v7  ;;  %v339_v23 = vadd.f32 %v338_v16, %v337_v8  ;;  %v311_v26 = vadd.f32 %v310_v21, %v309_v14 }
  0x6b   : > { %v354_v38 = vadd.s32 4294967288, %v349_v37 }
  0x6c   : > { %v451_v27 = vsel %vm390_vm2, %v304_v22, %v450_v24  ;;  %v461_v28 = vsel %vm392_vm3, %v339_v23, %v460_v25 }
  0x6d   : > { %463 = vst.msk [vmem:[#allocation5] sm:$0xf] %vm395_vm4, %v461_v28  ;;  %v452_v29 = vsel %vm392_vm3, %v311_v26, %v451_v27  ;;  %v357_v42 = vsub.s32 %v354_v38, %v351_v41 }
  0x6e   : > { %258 = vadd.xlane.f32.xlu1 %v257_v44  ;;  %255 = vadd.xlane.f32.xlu0 %v254_v45  ;;  %454 = vst.msk [vmem:[#allocation4] sm:$0xf] %vm395_vm4, %v452_v29  ;;  %v1252_v45 = vsub.s32 %v349_v37, %v351_v41 }
  0x72   : > { %282 = vadd.xlane.f32.xlu1 %v281_v35  ;;  %279 = vadd.xlane.f32.xlu0 %v278_v36 }
  0x74   : > { %v528_v22 = vld [vmem:[#allocation5] sm:$0xf] }
  0x75   : > { %v508_v18 = vld [vmem:[#allocation4] sm:$0xf]  ;;  %v529_v27 = vmul.f32 0.0625, %v528_v22 }
  0x76   : > { %v509_v21 = vmul.f32 0.0625, %v508_v18 }
  0x77   : > { %v530_v29 = vsel %vm395_vm4, %v529_v27, -inf }
  0x78   : > { %v510_v26 = vsel %vm395_vm4, %v509_v21, -inf }
  0xe3   : > { %v244_v30 = vpop.xlane.xlu1 %243  ;;  %v238_v31 = vpop.xlane.xlu0 %237 }
  0xe4   : > { %v364_v52 = vrot.slane %v244_v30, %v1252_v45  ;;  %v353_v53 = vrot.slane %v238_v31, %v1252_v45 }
  0xe7   : > { %v247_v32 = vpop.xlane.xlu1 %246  ;;  %v241_v33 = vpop.xlane.xlu0 %240 }
  0xe8   : > { %v368_v46 = vrot.slane %v247_v32, %v357_v42  ;;  %v358_v47 = vrot.slane %v241_v33, %v357_v42 }
  0xea   : > { %v369_v54 = vsel %vm359_vm5, %v368_v46, %v364_v52  ;;  %v360_v55 = vsel %vm359_vm5, %v358_v47, %v353_v53 }
  0xeb   : > { %v265_v35 = vpop.xlane.xlu1 %264  ;;  %v262_v36 = vpop.xlane.xlu0 %261  ;;  %v389_v3 = vsel %vm388_vm1, %v369_v54, %v360_v55 }
  0xec   : > { %v412_v63 = vrot.slane %v265_v35, %v357_v42  ;;  %v408_v0 = vrot.slane %v262_v36, %v1252_v45 }
  0xee   : > { %v413_v11 = vsel %vm359_vm5, %v412_v63, %v408_v0 }
  0xef   : > { %v271_v39 = vpop.xlane.xlu1 %270  ;;  %v268_v40 = vpop.xlane.xlu0 %267 }
  0xf0   : > { %v421_v56 = vrot.slane %v271_v39, %v357_v42  ;;  %v417_v57 = vrot.slane %v268_v40, %v1252_v45 }
  0xf2   : > { %v422_v4 = vsel %vm359_vm5, %v421_v56, %v417_v57 }
  0xf3   : > { %v253_v43 = vpop.xlane.xlu1 %252  ;;  %v250_v44 = vpop.xlane.xlu0 %249  ;;  %v441_v14 = vsel %vm388_vm1, %v422_v4, %v413_v11 }
  0xf4   : > { %v377_v48 = vrot.slane %v253_v43, %v357_v42  ;;  %v373_v49 = vrot.slane %v250_v44, %v1252_v45 }
  0xf6   : > { %v378_v58 = vsel %vm359_vm5, %v377_v48, %v373_v49 }
  0xf7   : > { %v277_v50 = vpop.xlane.xlu1 %276  ;;  %v274_v51 = vpop.xlane.xlu0 %273  ;;  %v391_v5 = vsel %vm390_vm2, %v378_v58, %v389_v3 }
  0xf8   : > { %v430_v59 = vrot.slane %v277_v50, %v357_v42  ;;  %v426_v60 = vrot.slane %v274_v51, %v1252_v45 }
  0xfa   : > { %v431_v7 = vsel %vm359_vm5, %v430_v59, %v426_v60 }
  0xfb   : > { %v259_v61 = vpop.xlane.xlu1 %258  ;;  %v256_v62 = vpop.xlane.xlu0 %255  ;;  %v442_v15 = vsel %vm390_vm2, %v431_v7, %v441_v14 }
  0xfc   : > { %v386_v1 = vrot.slane %v259_v61, %v357_v42  ;;  %v382_v2 = vrot.slane %v256_v62, %v1252_v45 }
  0xfe   : > { %v387_v6 = vsel %vm359_vm5, %v386_v1, %v382_v2 }
  0xff   : > { %v393_v8 = vsel %vm392_vm3, %v387_v6, %v391_v5  ;;  %v283_v9 = vpop.xlane.xlu1 %282  ;;  %v280_v10 = vpop.xlane.xlu0 %279 }
 0x100   : > { %396 = vst.msk [vmem:[#allocation2] sm:$0xf] %vm395_vm4, %v393_v8  ;;  %v439_v12 = vrot.slane %v283_v9, %v357_v42  ;;  %v435_v13 = vrot.slane %v280_v10, %v1252_v45 }
 0x102   : > { %v440_v16 = vsel %vm359_vm5, %v439_v12, %v435_v13 }
 0x103   : > { %v443_v17 = vsel %vm392_vm3, %v440_v16, %v442_v15 }
 0x104   : > { %445 = vst.msk [vmem:[#allocation3] sm:$0xf] %vm395_vm4, %v443_v17 }
 0x107   : > { %v468_v19 = vld [vmem:[#allocation2] sm:$0xf] }
 0x108   : > { %v469_v20 = vmul.f32 0.0625, %v468_v19 }
 0x10a   : > { %v470_v23 = vsel %vm395_vm4, %v469_v20, -inf }
 0x10b   : > { %471 = vmax.xlane.f32.xlu0 %v470_v23  ;;  %v488_v24 = vld [vmem:[#allocation3] sm:$0xf] }
 0x10c   : > { %v489_v25 = vmul.f32 0.0625, %v488_v24 }
 0x10e   : > { %v490_v28 = vsel %vm395_vm4, %v489_v25, -inf }
 0x10f   : > { %491 = vmax.xlane.f32.xlu1 %v490_v28  ;;  %511 = vmax.xlane.f32.xlu0 %v510_v26 }
 0x113   : > { %531 = vmax.xlane.f32.xlu1 %v530_v29 }
 0x198   : > { %v472_v30 = vpop.xlane.xlu0 %471 }
 0x199   : > { %v473_v31 = vsub.f32 %v469_v20, %v472_v30 }
 0x19b   : > { %v474_v32 = vmul.f32 1.442695, %v473_v31 }
 0x19c   : > { %v492_v33 = vpop.xlane.xlu1 %491  ;;  %v512_v34 = vpop.xlane.xlu0 %511 }
 0x19d   : > { %831 = vpow2.f32 %v474_v32  ;;  %v493_v35 = vsub.f32 %v489_v25, %v492_v33  ;;  %v513_v36 = vsub.f32 %v509_v21, %v512_v34 }
 0x19f   : > { %v494_v37 = vmul.f32 1.442695, %v493_v35  ;;  %v514_v38 = vmul.f32 1.442695, %v513_v36 }
 0x1a0   : > { %v532_v39 = vpop.xlane.xlu1 %531 }
 0x1a1   : > { %833 = vpow2.f32 %v494_v37  ;;  %v533_v40 = vsub.f32 %v529_v27, %v532_v39 }
 0x1a2   : > { %835 = vpow2.f32 %v514_v38 }
 0x1a3   : > { %v534_v41 = vmul.f32 1.442695, %v533_v40 }
 0x1a5   : > { %837 = vpow2.f32 %v534_v41 }
 0x1a7   : > { %v832_v42 = vpop.eup %831 }
 0x1a8   : > { %v476_v43 = vsel %vm395_vm4, %v832_v42, 0.0 }
 0x1a9   : > { %477 = vadd.xlane.f32.xlu0 %v476_v43 }
 0x1ab   : > { %v834_v44 = vpop.eup %833 }
 0x1ac   : > { %v836_v46 = vpop.eup %835  ;;  %v496_v47 = vsel %vm395_vm4, %v834_v44, 0.0 }
 0x1ad   : > { %497 = vadd.xlane.f32.xlu1 %v496_v47  ;;  %v516_v48 = vsel %vm395_vm4, %v836_v46, 0.0 }
 0x1ae   : > { %517 = vadd.xlane.f32.xlu0 %v516_v48 }
 0x1af   : > { %v838_v49 = vpop.eup %837 }
 0x1b0   : > { %v536_v50 = vsel %vm395_vm4, %v838_v49, 0.0 }
 0x1b1   : > { %537 = vadd.xlane.f32.xlu1 %v536_v50 }
 0x236   : > { %v478_v51 = vpop.xlane.xlu0 %477 }
 0x237   : > { %839 = vrcp.f32 %v478_v51 }
 0x23a   : > { %v498_v52 = vpop.xlane.xlu1 %497 }
 0x23b   : > { %841 = vrcp.f32 %v498_v52  ;;  %v518_v53 = vpop.xlane.xlu0 %517 }
 0x23c   : > { %843 = vrcp.f32 %v518_v53 }
 0x23e   : > { %v538_v54 = vpop.xlane.xlu1 %537 }
 0x23f   : > { %845 = vrcp.f32 %v538_v54 }
 0x241   : > { %v840_v55 = vpop.eup %839 }
 0x242   : > { %v480_v56 = vmul.f32 %v840_v55, %v832_v42 }
 0x244   : > { %v481_v57 = vmul.f32 %v480_v56, %v480_v56 }
 0x245   : > { %v842_v58 = vpop.eup %841 }
 0x246   : > { %v844_v59 = vpop.eup %843  ;;  %v482_v60 = vsel %vm395_vm4, %v481_v57, 0.0  ;;  %v500_v61 = vmul.f32 %v842_v58, %v834_v44 }
 0x247   : > { %483 = vadd.xlane.f32.xlu0 %v482_v60  ;;  %v520_v62 = vmul.f32 %v844_v59, %v836_v46 }
 0x248   : > { %v501_v63 = vmul.f32 %v500_v61, %v500_v61 }
 0x249   : > { %v846_v0 = vpop.eup %845  ;;  %v521_v1 = vmul.f32 %v520_v62, %v520_v62 }
 0x24a   : > { %v502_v2 = vsel %vm395_vm4, %v501_v63, 0.0  ;;  %v540_v3 = vmul.f32 %v846_v0, %v838_v49 }
 0x24b   : > { %503 = vadd.xlane.f32.xlu1 %v502_v2  ;;  %v522_v4 = vsel %vm395_vm4, %v521_v1, 0.0 }
 0x24c   : > { %523 = vadd.xlane.f32.xlu0 %v522_v4  ;;  %v541_v5 = vmul.f32 %v540_v3, %v540_v3 }
 0x24e   : > { %v542_v6 = vsel %vm395_vm4, %v541_v5, 0.0 }
 0x24f   : > { %543 = vadd.xlane.f32.xlu1 %v542_v6 }
 0x2d4   : > { %v484_v7 = vpop.xlane.xlu0 %483 }
 0x2d5   : > { %v485_v8 = vmax.f32 %v484_v7, 1e-16 }
 0x2d7   : > { %847 = vrsqrt.f32 %v485_v8 }
 0x2d8   : > { %v504_v9 = vpop.xlane.xlu1 %503 }
 0x2d9   : > { %v505_v10 = vmax.f32 %v504_v9, 1e-16  ;;  %v524_v11 = vpop.xlane.xlu0 %523 }
 0x2da   : > { %v525_v12 = vmax.f32 %v524_v11, 1e-16 }
 0x2db   : > { %849 = vrsqrt.f32 %v505_v10 }
 0x2dc   : > { %851 = vrsqrt.f32 %v525_v12  ;;  %v544_v13 = vpop.xlane.xlu1 %543 }
 0x2dd   : > { %v545_v14 = vmax.f32 %v544_v13, 1e-16 }
 0x2df   : > { %853 = vrsqrt.f32 %v545_v14 }
 0x2e1   : > { %v848_v15 = vpop.eup %847 }
 0x2e2   : > { %v487_v16 = vmul.f32 %v848_v15, %v480_v56 }
 0x2e4   : > { %v558_v17 = vsel %vm395_vm4, %v487_v16, 0.0 }
 0x2e5   : > { %v850_v18 = vpop.eup %849  ;;  %v559_v19 = vrot.slane %v558_v17, 4 }
 0x2e6   : > { %v852_v20 = vpop.eup %851  ;;  %v507_v21 = vmul.f32 %v850_v18, %v500_v61 }
 0x2e7   : > { %v560_v22 = vadd.f32 %v559_v19, %v558_v17  ;;  %v527_v23 = vmul.f32 %v852_v20, %v520_v62 }
 0x2e8   : > { %v565_v24 = vsel %vm395_vm4, %v507_v21, 0.0  ;;  %v548_v52 = vmul.f32 %v507_v21, %v487_v16 }
 0x2e9   : > { %v854_v25 = vpop.eup %853  ;;  %v561_v26 = vrot.slane %v560_v22, 2  ;;  %v566_v27 = vrot.slane %v565_v24, 4  ;;  %v572_v28 = vsel %vm395_vm4, %v527_v23, 0.0 }
 0x2ea   : > { %v547_v29 = vmul.f32 %v854_v25, %v540_v3  ;;  %v573_v30 = vrot.slane %v572_v28, 4  ;;  %v549_v56 = vsel %vm395_vm4, %v548_v52, 0.0 }
 0x2eb   : > { %v562_v31 = vadd.f32 %v561_v26, %v560_v22  ;;  %v567_v32 = vadd.f32 %v566_v27, %v565_v24 }
 0x2ec   : > { %v574_v33 = vadd.f32 %v573_v30, %v572_v28  ;;  %v579_v34 = vsel %vm395_vm4, %v547_v29, 0.0  ;;  %v552_v58 = vmul.f32 %v547_v29, %v527_v23 }
 0x2ed   : > { %v568_v35 = vrot.slane %v567_v32, 2  ;;  %v580_v36 = vrot.slane %v579_v34, 4  ;;  %v563_v38 = vrot.slane %v562_v31, 1 }
 0x2ee   : > { %v575_v37 = vrot.slane %v574_v33, 2  ;;  %v553_v59 = vsel %vm395_vm4, %v552_v58, 0.0 }
 0x2ef   : > { %v569_v39 = vadd.f32 %v568_v35, %v567_v32  ;;  %v581_v40 = vadd.f32 %v580_v36, %v579_v34  ;;  %v564_v44 = vadd.f32 %v563_v38, %v562_v31 }
 0x2f0   : > { %v576_v41 = vadd.f32 %v575_v37, %v574_v33 }
 0x2f1   : > { %v570_v42 = vrot.slane %v569_v39, 1  ;;  %v582_v43 = vrot.slane %v581_v40, 2 }
 0x2f2   : > { %v577_v47 = vrot.slane %v576_v41, 1 }
 0x2f3   : > { %v571_v46 = vadd.f32 %v570_v42, %v569_v39  ;;  %v583_v48 = vadd.f32 %v582_v43, %v581_v40 }
 0x2f4   : > { %v578_v53 = vadd.f32 %v577_v47, %v576_v41 }
 0x2f5   : > { %v586_v49 = vmul.f32 %v571_v46, %v564_v44  ;;  %v584_v50 = vrot.slane %v583_v48, 1 }
 0x2f7   : > { %v588_v51 = vsel %vm587_vm6, %v586_v49, 0.0  ;;  %v585_v54 = vadd.f32 %v584_v50, %v583_v48 }
 0x2f8   : > { %589 = vadd.xlane.f32.xlu0 %v588_v51 }
 0x2f9   : > { %v598_v55 = vmul.f32 %v585_v54, %v578_v53 }
 0x2fb   : > { %v599_v57 = vsel %vm587_vm6, %v598_v55, 0.0 }
 0x2fc   : > { %550 = vadd.xlane.f32.xlu0 %v549_v56  ;;  %600 = vadd.xlane.f32.xlu1 %v599_v57 }
 0x300   : > { %554 = vadd.xlane.f32.xlu1 %v553_v59 }
 0x385   : > { %v590_v60 = vpop.xlane.xlu0 %589 }
 0x386   : > { %v591_v61 = vrot.slane %v590_v60, 4 }
 0x388   : > { %v592_v62 = vadd.f32 %v591_v61, %v590_v60 }
 0x389   : > { %v601_v63 = vpop.xlane.xlu1 %600  ;;  %v551_v12 = vpop.xlane.xlu0 %550 }
 0x38a   : > { %v593_v0 = vrot.slane %v592_v62, 2  ;;  %v602_v1 = vrot.slane %v601_v63, 4 }
 0x38c   : > { %v603_v2 = vadd.f32 %v602_v1, %v601_v63  ;;  %v594_v3 = vadd.f32 %v593_v0, %v592_v62 }
 0x38d   : > { %v555_v11 = vpop.xlane.xlu1 %554 }
 0x38e   : > { %v604_v4 = vrot.slane %v603_v2, 2  ;;  %v595_v5 = vrot.slane %v594_v3, 1  ;;  %v556_v13 = vadd.f32 %v555_v11, %v551_v12 }
 0x390   : > { %v596_v6 = vadd.f32 %v595_v5, %v594_v3  ;;  %v605_v7 = vadd.f32 %v604_v4, %v603_v2  ;;  %v557_v14 = vmul.f32 0.5, %v556_v13 }
 0x392   : > { %758 = vpush %v596_v6  ;;  %v606_v8 = vrot.slane %v605_v7, 1 }
 0x394   : > { %v607_v9 = vadd.f32 %v606_v8, %v605_v7 }
 0x396   : > { %760 = vpush %v607_v9 }
 0x3c3   : > { %s759_s21 = spop %758 }
 0x3c7   : > { %s761_s8 = spop %760 }
 0x3c8   : > { %s609_s18 = sadd.f32 %s761_s8, %s759_s21 }
 0x3ca   : > { %s610_s19 = smul.f32 0.5, %s609_s18 }
 0x3cc   : > { %v611_v10 = vstv %s610_s19 }
 0x3cd   : > { %855 = vrcp.f32 %v611_v10 }
 0x3d7   : > { %v856_v15 = vpop.eup %855 }
 0x3d8   : > { %v613_v16 = vmul.f32 %v856_v15, %v557_v14 }
 0x3da   : > { %857 = vlog2.f32 %v613_v16 }
 0x3e4   : > { %v858_v17 = vpop.eup %857 }
 0x3e5   : > { %v615_v18 = vmul.f32 0.6931472, %v858_v17 }
 0x3e7   : > { %v616_v19 = vsub.f32 0.0, %v615_v18 }
 0x3e9   : > { %v617_v20 = vmul.f32 0.125, %v616_v19 }
 0x3eb   : > { %v622_v21 = vrot.slane %v617_v20, %v1252_v45 }
 0x3ed   : > { %625 = vst.msk [vmem:[%s218_s30] sm:$0x1] %vm624_vm7, %v622_v21 }
 0x3ee   : > { %932 = shalt.err (!%p929_p11)
}
 0x3ef   : > { %s933_s4 = scalar_lea.hbm %s1302_s16, 16  ;;  %s937_s7 = scalar_lea.hbm %s1353_s2, 32 }
 0x3f0   : > { %p934_p1 = scmp.ne.s32.totalorder %s1302_s16, %s933_s4  ;;  %p938_p5 = scmp.lt.u32.totalorder %s1302_s16, %s1353_s2 }
 0x3f1   : > { %p939_p4 = scmp.lt.u32.totalorder %s937_s7, %s933_s4  ;;  %p941_p0 = scmp.lt.u32.totalorder %s933_s4, %s1302_s16 }
 0x3f2   : > { %p935_p6 = pnand %p934_p1, %p1364_p3 }
 0x3f3   : > { %p940_p8 = por %p939_p4, %p938_p5 }
 0x3f4   : > { %p936_p2 = pneg %p935_p6 }
 0x3f5   : > { %p942_p12 = por %p941_p0, %p940_p8 }
 0x3f7   : > { %p943_p13 = pnand %p942_p12, %p936_p2 }
 0x3f9   : > { %946 = shalt.err (!%p943_p13)
}
 0x3fa   : > { %766 = dma.vmem_to_hbm [thread:$0]  (%p1364_p3), %s1304_s3, 16, %s1302_s16, %s627_s20  }
 0x3fb PF: > { %s651_s18 = sand.u32 1, %s985_s9   ;;  %p1365_p7 = scmp.ne.s32.totalorder %s1359_s24, 0 }
 0x3fc   : > { %p1366_p10 = scmp.ge.s32.totalorder %s1005_s14, 2  ;;  %s652_s19 = scalar_lea.sflag [#allocation8], %s651_s18 }
 0x3fe   : > { %p776_p9 = pnand %p1366_p10, %p1365_p7 }
 0x400   : > { %980 = dma.done.wait (!%p776_p9), %s652_s19, 16  }
 0x401   : > { %982 = vsyncadd (!%p776_p9), %s652_s19, 4294967280  ;;  %s21_s14 = sadd.s32 1, %s1005_s14   ;;  %s1367_s9 = smov %s989_s10 }
 0x402   : > { %p18_p11 = scmp.ge.s32.totalorder %s21_s14, 4   ;;  %s1368_s10 = smov %s993_s11 }
 0x403   : > { %s1369_s11 = smov %s1083_s23  ;;  %s1370_s12 = smov %s1001_s13 }
 0x404   : > { %s1371_s13 = smov %s1373_s17  ;;  %20 = sbr.rel (!%p18_p11) target bundleno = 8 (0x8), region = 90 }
 0x40b   :  { %656 = vsyncpa [#allocation7], 1 }
 0x40c   :  { %658 = vsyncpa [#allocation7 + $0x1], 1 }
 0x40d   :  { %659 = vsyncpa [#allocation10], 1 }
 0x40e   :  { %661 = vsyncpa [#allocation10 + $0x1], 1 }
 0x40f   :  { %662 = vsyncpa [#allocation8], 1 }
 0x410   :  { %664 = vsyncpa [#allocation8 + $0x1], 1 }

</bundles_post_ra>
